<compile_context>
chip_gen: v7x
topology: tpu7x:2x2x1
jax: 0.10.0
libtpu: 0.0.40
codegen_flags: <defaults>
</compile_context>

<pallas_src>
import jax
import jax.numpy as jnp
from jax.experimental import pallas as pl
from jax.experimental.pallas import tpu as pltpu


def _sigmoid(x):
    # Mathematically identical to 1/(1+exp(-x)); tanh is a single EUP op that
    # co-issues with MXU/VPU work.
    return 0.5 * (jnp.tanh(0.5 * x) + 1.0)


def _mlp_kernel(x_ref, w1_ref, b1_ref, w2_ref, b2_ref, o_ref):
    # First linear + sigmoid (MXU matmul, f32 accumulation; bias/act on VPU/EUP).
    h = jnp.dot(x_ref[...], w1_ref[...], preferred_element_type=jnp.float32)
    h = _sigmoid(h + b1_ref[...])
    # Second linear + sigmoid; lane-dense (padded-to-128) unmasked store.
    o = jnp.dot(h, w2_ref[...], preferred_element_type=jnp.float32)
    o_ref[...] = _sigmoid(o + b2_ref[...]).astype(o_ref.dtype)


def _round_up(n, m):
    return (n + m - 1) // m * m


def prepare_params(w1, b1, w2, b2):
    """One-time pad of weights/biases to native TPU tile geometry.

    Weights are stored pre-transposed as (in, out) so the kernel computes
    x @ W + b on the MXU (PyTorch Linear stores (out, in)).  Zero padding is
    exact for this MLP: padded hidden units are sigmoid(0)=0.5 but only ever
    multiply zero rows of the padded w2; padded output lanes are sliced off.
    """
    D = w1.shape[0]
    O = w2.shape[1]
    Dp = _round_up(D, 128)
    Op = _round_up(O, 128)
    w1_p = jnp.pad(w1, ((0, Dp - D), (0, Dp - D)))
    b1_p = jnp.pad(b1, (0, Dp - D)).reshape(1, Dp)
    w2_p = jnp.pad(w2, ((0, Dp - D), (0, Op - O)))
    b2_p = jnp.pad(b2, (0, Op - O)).reshape(1, Op)
    # Ensure the padded copies are committed to device HBM once, up front.
    params = jax.device_put((w1_p, b1_p, w2_p, b2_p))
    return params, (D, O, Dp, Op)


def make_forward(w1, b1, w2, b2):
    """Returns a jit'd forward(x) closing over pre-padded, device-resident params."""
    (w1_p, b1_p, w2_p, b2_p), (D, O, Dp, Op) = prepare_params(w1, b1, w2, b2)
    vmem = pltpu.MemorySpace.VMEM

    @jax.jit
    def forward(x):
        B = x.shape[0]
        x2d = x.reshape(B, D)                     # Flatten(start_dim=1)
        Bp = _round_up(B, 8)                      # sublane multiple for f32
        x_p = jnp.pad(x2d, ((0, Bp - B), (0, Dp - D)))

        cost = pl.CostEstimate(
            flops=2 * Bp * Dp * Dp + 2 * Bp * Dp * Op,
            transcendentals=Bp * Dp + Bp * Op,     # one tanh per activation
            bytes_accessed=4 * (Bp * Dp + Dp * Dp + Dp + Dp * Op + Op + Bp * Op),
        )

        out_p = pl.pallas_call(
            _mlp_kernel,
            out_shape=jax.ShapeDtypeStruct((Bp, Op), jnp.float32),
            in_specs=[
                pl.BlockSpec(memory_space=vmem),   # x
                pl.BlockSpec(memory_space=vmem),   # w1
                pl.BlockSpec(memory_space=vmem),   # b1
                pl.BlockSpec(memory_space=vmem),   # w2
                pl.BlockSpec(memory_space=vmem),   # b2
            ],
            out_specs=pl.BlockSpec(memory_space=vmem),
            cost_estimate=cost,
        )(x_p, w1_p, b1_p, w2_p, b2_p)

        # Un-pad: wrapper-side slice glue only.
        return out_p[:B, :O]

    return forward


if __name__ == "__main__":
    # Shapes: x = (B=2, C=2, H=4, W=4)  ->  input_dim D = 32, output_dim O = 8.
    B, C, H, W = 2, 2, 4, 4
    D = C * H * W
    O = 8

    key = jax.random.PRNGKey(0)
    kx, kw1, kb1, kw2, kb2 = jax.random.split(key, 5)

    x = jax.random.normal(kx, (B, C, H, W), dtype=jnp.float32)

    # Deterministic synthetic parameters (PyTorch Linear init range), stored
    # pre-transposed as (in, out).
    lim1 = 1.0 / jnp.sqrt(D)
    w1 = jax.random.uniform(kw1, (D, D), minval=-lim1, maxval=lim1, dtype=jnp.float32)
    b1 = jax.random.uniform(kb1, (D,), minval=-lim1, maxval=lim1, dtype=jnp.float32)
    lim2 = 1.0 / jnp.sqrt(D)
    w2 = jax.random.uniform(kw2, (D, O), minval=-lim2, maxval=lim2, dtype=jnp.float32)
    b2 = jax.random.uniform(kb2, (O,), minval=-lim2, maxval=lim2, dtype=jnp.float32)

    # Prepare (pad) params once; per-call forward only pads x / slices output.
    forward = make_forward(w1, b1, w2, b2)

    out = forward(x)
    out = jax.block_until_ready(out)

    # Pure-JAX reference check (same math as the PyTorch forward).
    x2d = x.reshape(B, D)
    ref = jax.nn.sigmoid(jax.nn.sigmoid(x2d @ w1 + b1) @ w2 + b2)
    assert out.shape == (B, O)
    assert jnp.allclose(out, ref, atol=1e-5, rtol=1e-5)

    print("KERNEL_OK")
</pallas_src>

<mosaic_0001>
module attributes {stable_mosaic.version = 11 : i64} {
  func.func @_mlp_kernel(%arg0: memref<8x128xf32, #tpu.memory_space<vmem>>, %arg1: memref<128x128xf32, #tpu.memory_space<vmem>>, %arg2: memref<1x128xf32, #tpu.memory_space<vmem>>, %arg3: memref<128x128xf32, #tpu.memory_space<vmem>>, %arg4: memref<1x128xf32, #tpu.memory_space<vmem>>, %arg5: memref<8x128xf32, #tpu.memory_space<vmem>>) attributes {dimension_semantics = [], scalar_prefetch = 0 : i64, scratch_operands = 0 : i64, tpu.core_type = #tpu.core_type<tc>} {
    %c0 = arith.constant 0 : index
    %c0_0 = arith.constant 0 : index
    %0 = vector.load %arg0[%c0, %c0_0] : memref<8x128xf32, #tpu.memory_space<vmem>>, vector<8x128xf32>
    %c0_1 = arith.constant 0 : index
    %c0_2 = arith.constant 0 : index
    %1 = vector.load %arg1[%c0_1, %c0_2] : memref<128x128xf32, #tpu.memory_space<vmem>>, vector<128x128xf32>
    %cst = arith.constant dense<0.000000e+00> : vector<8x128xf32>
    %2 = tpu.matmul %0, %1, %cst {dimension_numbers = #tpu.dot_dimension_numbers<[1], [0], [0], [1], [0, 0, 1, 1], [], []>} : vector<8x128xf32>, vector<128x128xf32>, vector<8x128xf32> -> vector<8x128xf32>
    %c0_3 = arith.constant 0 : index
    %c0_4 = arith.constant 0 : index
    %3 = vector.load %arg2[%c0_3, %c0_4] : memref<1x128xf32, #tpu.memory_space<vmem>>, vector<1x128xf32>
    %4 = vector.broadcast %3 : vector<1x128xf32> to vector<8x128xf32>
    %5 = arith.addf %2, %4 : vector<8x128xf32>
    %cst_5 = arith.constant 5.000000e-01 : f32
    %6 = vector.broadcast %cst_5 : f32 to vector<8x128xf32>
    %7 = arith.mulf %6, %5 : vector<8x128xf32>
    %8 = math.tanh %7 : vector<8x128xf32>
    %cst_6 = arith.constant 1.000000e+00 : f32
    %9 = vector.broadcast %cst_6 : f32 to vector<8x128xf32>
    %10 = arith.addf %8, %9 : vector<8x128xf32>
    %cst_7 = arith.constant 5.000000e-01 : f32
    %11 = vector.broadcast %cst_7 : f32 to vector<8x128xf32>
    %12 = arith.mulf %11, %10 : vector<8x128xf32>
    %c0_8 = arith.constant 0 : index
    %c0_9 = arith.constant 0 : index
    %13 = vector.load %arg3[%c0_8, %c0_9] : memref<128x128xf32, #tpu.memory_space<vmem>>, vector<128x128xf32>
    %cst_10 = arith.constant dense<0.000000e+00> : vector<8x128xf32>
    %14 = tpu.matmul %12, %13, %cst_10 {dimension_numbers = #tpu.dot_dimension_numbers<[1], [0], [0], [1], [0, 0, 1, 1], [], []>} : vector<8x128xf32>, vector<128x128xf32>, vector<8x128xf32> -> vector<8x128xf32>
    %c0_11 = arith.constant 0 : index
    %c0_12 = arith.constant 0 : index
    %15 = vector.load %arg4[%c0_11, %c0_12] : memref<1x128xf32, #tpu.memory_space<vmem>>, vector<1x128xf32>
    %16 = vector.broadcast %15 : vector<1x128xf32> to vector<8x128xf32>
    %17 = arith.addf %14, %16 : vector<8x128xf32>
    %cst_13 = arith.constant 5.000000e-01 : f32
    %18 = vector.broadcast %cst_13 : f32 to vector<8x128xf32>
    %19 = arith.mulf %18, %17 : vector<8x128xf32>
    %20 = math.tanh %19 : vector<8x128xf32>
    %cst_14 = arith.constant 1.000000e+00 : f32
    %21 = vector.broadcast %cst_14 : f32 to vector<8x128xf32>
    %22 = arith.addf %20, %21 : vector<8x128xf32>
    %cst_15 = arith.constant 5.000000e-01 : f32
    %23 = vector.broadcast %cst_15 : f32 to vector<8x128xf32>
    %24 = arith.mulf %23, %22 : vector<8x128xf32>
    %c0_16 = arith.constant 0 : index
    %c0_17 = arith.constant 0 : index
    %25 = vector.load %arg5[%c0_16, %c0_17] : memref<8x128xf32, #tpu.memory_space<vmem>>, vector<8x128xf32>
    tpu.vector_store %arg5[%c0_16, %c0_17], %24 {strides = array<i32>} : memref<8x128xf32, #tpu.memory_space<vmem>>, vector<8x128xf32>,
    return
  }
}

</mosaic_0001>

<bundles_post_ra>
// kernel: forward.1
= control target key start
LH: loop header
LB: loop body
LE: loop exit
PB: predicated region body
PF: predicated region fallthrough
CT: control target
= control target key end

     0   :  { %10 = vsyncpa [#allocation3], 0  ;;  %s552_s0 = inlined_call_operand.vmem [shape: f32[8,128], index: 0, kind: input, shape index: {}]   ;;  %s553_s1 = inlined_call_operand.hbm [shape: f32[128,128], index: 1, kind: input, shape index: {}]   ;;  %s554_s2 = inlined_call_operand.vmem [shape: f32[1,128], index: 2, kind: input, shape index: {}]   ;;  %s555_s3 = inlined_call_operand.hbm [shape: f32[128,128], index: 3, kind: input, shape index: {}]   ;;  %s556_s4 = inlined_call_operand.vmem [shape: f32[1,128], index: 4, kind: input, shape index: {}]   ;;  %s557_s5 = inlined_call_operand.vmem [shape: f32[8,128], index: 5, kind: output, shape index: {}]  }
   0x1   :  { %11 = vsyncpa [#allocation5], 0  ;;  %s463_s18 = smov [#allocation2]   ;;  %s415_s22 = scalar_lea.hbm %s553_s1, 2048 }
   0x2   :  { %s19_s19 = sshll.u32 %s463_s18, 4  ;;  %p416_p0 = scmp.ne.s32.totalorder %s553_s1, %s415_s22  ;;  %s20_s19 = int_to_ptr.vmem [resolvable:$true] %s19_s19 }
   0x3   :  { %p419_p1 = scmp.lt.u32.totalorder %s415_s22, %s553_s1 }
   0x5   :  { %p421_p2 = pnand %p419_p1, %p416_p0 }
   0x7   :  { %424 = shalt.err (!%p421_p2)
}
   0x8   :  { %s425_s27 = scalar_lea.vmem %s20_s19, 2048  ;;  %p430_p4 = scmp.lt.s32.totalorder %s20_s19, %s20_s19 }
   0x9   :  { %p426_p3 = scmp.ne.s32.totalorder %s20_s19, %s425_s27  ;;  %p431_p5 = scmp.lt.s32.totalorder %s425_s27, %s425_s27 }
   0xb   :  { %p432_p6 = por %p431_p5, %p430_p4 }
   0xd   :  { %p433_p7 = pnand %p432_p6, %p426_p3 }
   0xf   :  { %436 = shalt.err (!%p433_p7)
}
  0x10   :  { %s464_s28 = smov 128   ;;  %s465_s29 = smov 8  }
  0x11   :  { %25 = dma.hbm_to_vmem [thread:$0]  %s553_s1, 2048, %s20_s19, [#allocation3], %s464_s28, %s464_s28, %s465_s29  }
  0x12   :  { %s466_s7 = smov [#allocation4]   ;;  %s437_s11 = scalar_lea.hbm %s555_s3, 2048 }
  0x13   :  { %s33_s8 = sshll.u32 %s466_s7, 4  ;;  %p438_p8 = scmp.ne.s32.totalorder %s555_s3, %s437_s11  ;;  %s34_s8 = int_to_ptr.vmem [resolvable:$true] %s33_s8 }
  0x14   :  { %p441_p9 = scmp.lt.u32.totalorder %s437_s11, %s555_s3 }
  0x16   :  { %p443_p10 = pnand %p441_p9, %p438_p8 }
  0x18   :  { %446 = shalt.err (!%p443_p10)
}
  0x19   :  { %s447_s16 = scalar_lea.vmem %s34_s8, 2048  ;;  %p452_p12 = scmp.lt.s32.totalorder %s34_s8, %s34_s8 }
  0x1a   :  { %p448_p11 = scmp.ne.s32.totalorder %s34_s8, %s447_s16  ;;  %p453_p13 = scmp.lt.s32.totalorder %s447_s16, %s447_s16 }
  0x1c   :  { %p454_p0 = por %p453_p13, %p452_p12 }
  0x1e   :  { %p455_p1 = pnand %p454_p0, %p448_p11 }
  0x20   :  { %458 = shalt.err (!%p455_p1)
}
  0x21   :  { %39 = dma.hbm_to_vmem [thread:$0]  %s555_s3, 2048, %s34_s8, [#allocation5], %s464_s28, %s464_s28, %s465_s29  }
  0x22   :  { %459 = dma.done.wait [#allocation3], 2048  }
  0x23   :  { %460 = vsyncadd [#allocation3], 4294965248 }
  0x24   :  { %461 = dma.done.wait [#allocation5], 2048  }
  0x25   :  { %462 = vsyncadd [#allocation5], 4294965248  ;;  %v467_v0 = vmov 0.0|0.0   ;;  %vm468_vm0 = vmmov 0   ;;  %v469_v1 = vmov 0.0   ;;  %v49_v2 = vld [vmem:[#allocation2] sm:$0xff] }
  0x26   :  { %356 = vmatprep.subr.bf16.mxu0 %v467_v0  ;;  %318 = vmatprep.mubr.msk.f32.mxu0 %vm468_vm0, %v469_v1  ;;  %v50_v3 = vld [vmem:[#allocation2 + $0x8] sm:$0xff]  ;;  %v51_v4 = vld [vmem:[#allocation2 + $0x10] sm:$0xff]  ;;  %v52_v6 = vld [vmem:[#allocation2 + $0x18] sm:$0xff] }
  0x27   :  { %380 = vmatprep.subr.bf16.mxu1 %v467_v0  ;;  %353 = vmatprep.mubr.msk.f32.mxu1 %vm468_vm0, %v469_v1  ;;  %v357_v5 = vpack.c.bf16 %v50_v3, %v49_v2  ;;  %v360_v7 = vpack.c.bf16 %v52_v6, %v51_v4  ;;  %v53_v8 = vld [vmem:[#allocation2 + $0x20] sm:$0xff]  ;;  %v54_v9 = vld [vmem:[#allocation2 + $0x28] sm:$0xff]  ;;  %v148_v12 = vld [vmem:[#allocation4 + $0x10] sm:$0xff] }
  0x28   :  { %v146_v10 = vld [vmem:[#allocation4] sm:$0xff]  ;;  %v147_v11 = vld [vmem:[#allocation4 + $0x8] sm:$0xff]  ;;  %v149_v13 = vld [vmem:[#allocation4 + $0x18] sm:$0xff]  ;;  %v363_v14 = vpack.c.bf16 %v54_v9, %v53_v8 }
  0x29   :  { %358 = vmatpush3.bf16.msra.mxu0 %v357_v5  ;;  %v381_v15 = vpack.c.bf16 %v147_v11, %v146_v10  ;;  %v55_v16 = vld [vmem:[#allocation2 + $0x30] sm:$0xff]  ;;  %v56_v17 = vld [vmem:[#allocation2 + $0x38] sm:$0xff]  ;;  %v384_v18 = vpack.c.bf16 %v149_v13, %v148_v12  ;;  %v150_v19 = vld [vmem:[#allocation4 + $0x20] sm:$0xff] }
  0x2a   :  { %359 = vmatprep.subr.bf16.mxu0 %v467_v0  ;;  %v151_v20 = vld [vmem:[#allocation4 + $0x28] sm:$0xff]  ;;  %v366_v21 = vpack.c.bf16 %v56_v17, %v55_v16  ;;  %v57_v22 = vld [vmem:[#allocation2 + $0x40] sm:$0xff]  ;;  %v59_v26 = vld [vmem:[#allocation2 + $0x50] sm:$0xff] }
  0x2b   :  { %382 = vmatpush3.bf16.msra.mxu1 %v381_v15  ;;  %v58_v23 = vld [vmem:[#allocation2 + $0x48] sm:$0xff]  ;;  %v387_v24 = vpack.c.bf16 %v151_v20, %v150_v19  ;;  %v60_v27 = vld [vmem:[#allocation2 + $0x58] sm:$0xff]  ;;  %v61_v29 = vld [vmem:[#allocation2 + $0x60] sm:$0xff] }
  0x2c   :  { %383 = vmatprep.subr.bf16.mxu1 %v467_v0  ;;  %v369_v25 = vpack.c.bf16 %v58_v23, %v57_v22  ;;  %v372_v28 = vpack.c.bf16 %v60_v27, %v59_v26  ;;  %v62_v30 = vld [vmem:[#allocation2 + $0x68] sm:$0xff]  ;;  %v63_v32 = vld [vmem:[#allocation2 + $0x70] sm:$0xff]  ;;  %v64_v33 = vld [vmem:[#allocation2 + $0x78] sm:$0xff] }
  0x2d   :  { %361 = vmatpush3.bf16.msra.mxu0 %v360_v7  ;;  %v375_v31 = vpack.c.bf16 %v62_v30, %v61_v29  ;;  %v378_v34 = vpack.c.bf16 %v64_v33, %v63_v32  ;;  %v48_v35 = vld [vmem:[%s552_s0] sm:$0xff]  ;;  %v152_v36 = vld [vmem:[#allocation4 + $0x30] sm:$0xff]  ;;  %v153_v37 = vld [vmem:[#allocation4 + $0x38] sm:$0xff] }
  0x2e   :  { %362 = vmatprep.subr.bf16.mxu0 %v467_v0  ;;  %v390_v38 = vpack.c.bf16 %v153_v37, %v152_v36  ;;  %v154_v39 = vld [vmem:[#allocation4 + $0x40] sm:$0xff]  ;;  %v155_v40 = vld [vmem:[#allocation4 + $0x48] sm:$0xff]  ;;  %v156_v42 = vld [vmem:[#allocation4 + $0x50] sm:$0xff] }
  0x2f   :  { %385 = vmatpush3.bf16.msra.mxu1 %v384_v18  ;;  %v393_v41 = vpack.c.bf16 %v155_v40, %v154_v39  ;;  %v157_v43 = vld [vmem:[#allocation4 + $0x58] sm:$0xff]  ;;  %v158_v45 = vld [vmem:[#allocation4 + $0x60] sm:$0xff]  ;;  %v159_v46 = vld [vmem:[#allocation4 + $0x68] sm:$0xff] }
  0x30   :  { %386 = vmatprep.subr.bf16.mxu1 %v467_v0  ;;  %v396_v44 = vpack.c.bf16 %v157_v43, %v156_v42  ;;  %v399_v47 = vpack.c.bf16 %v159_v46, %v158_v45  ;;  %v160_v48 = vld [vmem:[#allocation4 + $0x70] sm:$0xff]  ;;  %v161_v49 = vld [vmem:[#allocation4 + $0x78] sm:$0xff]  ;;  %v250_v51 = vld [vmem:[%s554_s2] ss:$0 sm:$0xff] }
  0x31   :  { %364 = vmatpush3.bf16.msra.mxu0 %v363_v14  ;;  %v402_v50 = vpack.c.bf16 %v161_v49, %v160_v48  ;;  %v251_v59 = vld [vmem:[%s556_s4] ss:$0 sm:$0xff] }
  0x32   :  { %365 = vmatprep.subr.bf16.mxu0 %v467_v0 }
  0x33   :  { %388 = vmatpush3.bf16.msra.mxu1 %v387_v24 }
  0x34   :  { %389 = vmatprep.subr.bf16.mxu1 %v467_v0 }
  0x35   :  { %367 = vmatpush3.bf16.msra.mxu0 %v366_v21 }
  0x36   :  { %368 = vmatprep.subr.bf16.mxu0 %v467_v0 }
  0x37   :  { %391 = vmatpush3.bf16.msra.mxu1 %v390_v38 }
  0x38   :  { %392 = vmatprep.subr.bf16.mxu1 %v467_v0 }
  0x39   :  { %370 = vmatpush3.bf16.msra.mxu0 %v369_v25 }
  0x3a   :  { %371 = vmatprep.subr.bf16.mxu0 %v467_v0 }
  0x3b   :  { %394 = vmatpush3.bf16.msra.mxu1 %v393_v41 }
  0x3c   :  { %395 = vmatprep.subr.bf16.mxu1 %v467_v0 }
  0x3d   :  { %373 = vmatpush3.bf16.msra.mxu0 %v372_v28 }
  0x3e   :  { %374 = vmatprep.subr.bf16.mxu0 %v467_v0 }
  0x3f   :  { %397 = vmatpush3.bf16.msra.mxu1 %v396_v44 }
  0x40   :  { %398 = vmatprep.subr.bf16.mxu1 %v467_v0 }
  0x41   :  { %376 = vmatpush3.bf16.msra.mxu0 %v375_v31 }
  0x42   :  { %377 = vmatprep.subr.bf16.mxu0 %v467_v0 }
  0x43   :  { %400 = vmatpush3.bf16.msra.mxu1 %v399_v47 }
  0x44   :  { %401 = vmatprep.subr.bf16.mxu1 %v467_v0 }
  0x45   :  { %379 = vmatpush3.bf16.msra.mxu0 %v378_v34 }
  0x47   :  { %403 = vmatpush3.bf16.msra.mxu1 %v402_v50 }
  0x48   :  { %319 = vmatmul.mubr.f32.vlgmr.msra.gmra.mrb[0].mxu0 %v48_v35 }
 0x11b   :  { %v138_v52 = vpop.f32.mrb[0].mxu0 }
 0x11c   :  { %v139_v53 = vadd.f32 %v250_v51, %v138_v52  ;;  %v320_v54 = vpop.f32.mrb[1].mxu0 }
 0x11e   :  { %v142_v55 = vmul.f32 0.5, %v139_v53 }
 0x120   :  { %411 = vtanh.f32 %v142_v55 }
 0x12a   :  { %v412_v56 = vpop.eup %411 }
 0x12b   :  { %v144_v57 = vadd.f32 1.0, %v412_v56 }
 0x12d   :  { %v145_v58 = vmul.f32 0.5, %v144_v57 }
 0x12f   :  { %354 = vmatmul.mubr.f32.vlgmr.msra.gmra.mrb[0].mxu1 %v145_v58 }
 0x202   :  { %v235_v60 = vpop.f32.mrb[0].mxu1 }
 0x203   :  { %v236_v61 = vadd.f32 %v251_v59, %v235_v60  ;;  %v355_v62 = vpop.f32.mrb[1].mxu1 }
 0x205   :  { %v239_v63 = vmul.f32 0.5, %v236_v61 }
 0x207   :  { %413 = vtanh.f32 %v239_v63 }
 0x211   :  { %v414_v0 = vpop.eup %413 }
 0x212   :  { %v241_v1 = vadd.f32 1.0, %v414_v0 }
 0x214   :  { %v242_v2 = vmul.f32 0.5, %v241_v1 }
 0x216   :  { %243 = vst [vmem:[%s557_s5] sm:$0xff] %v242_v2 }
 0x217   :  { %248 = vsyncpa [#allocation3], 1 }
 0x218   :  { %249 = vsyncpa [#allocation5], 1 }

</bundles_post_ra>
